<compile_context>
chip_gen: v7x
topology: tpu7x:2x2x1
jax: 0.10.0
libtpu: 0.0.40
codegen_flags: <defaults>
</compile_context>

<pallas_src>
import functools

import jax
import jax.numpy as jnp
from jax import lax
from jax.experimental import pallas as pl
from jax.experimental.pallas import tpu as pltpu

BN_EPS = 1e-5
LANE = 128
SUBLANE = 8


def _round_up(x, m):
    return (x + m - 1) // m * m


def _vmem_capacity_bytes():
    try:
        info = pltpu.get_tpu_info()
        cap = getattr(info, "vmem_capacity_bytes", None)
        if cap:
            return int(cap)
    except Exception:
        pass
    return 64 * 1024 * 1024  # conservative (v7x per-TC VMEM)


# ---------------------------------------------------------------------------
# Fused fast path: whole problem in one launch, u/v never touch HBM.
# Exact two-pass variance (no E[x^2]-mu^2 cancellation issue).
# ---------------------------------------------------------------------------
def _fused_kernel(h_ref, w1_ref, w2_ref, g1_ref, be1_ref, g2_ref, be2_ref,
                  o_ref, *, n_valid, masked):
    inv_n = 1.0 / n_valid

    u = jnp.dot(h_ref[...], w1_ref[...], preferred_element_type=jnp.float32)
    if masked:
        row = lax.broadcasted_iota(jnp.int32, (u.shape[0], 1), 0)
        valid = row < n_valid

    # BN1 (train-mode batch stats). Padded rows of u are exactly zero (h is
    # zero-padded along N), so the sum needs no mask; the centered squares do.
    mu1 = jnp.sum(u, axis=0, keepdims=True) * inv_n
    d1 = u - mu1
    d1m = jnp.where(valid, d1, 0.0) if masked else d1
    var1 = jnp.sum(d1m * d1m, axis=0, keepdims=True) * inv_n
    z = jnp.maximum(d1 * (g1_ref[...] * lax.rsqrt(var1 + BN_EPS)) + be1_ref[...], 0.0)
    if masked:
        z = jnp.where(valid, z, 0.0)  # zero padded rows so v's padded rows are zero

    v = jnp.dot(z.astype(jnp.bfloat16), w2_ref[...],
                preferred_element_type=jnp.float32)

    # BN2
    mu2 = jnp.sum(v, axis=0, keepdims=True) * inv_n
    d2 = v - mu2
    d2m = jnp.where(valid, d2, 0.0) if masked else d2
    var2 = jnp.sum(d2m * d2m, axis=0, keepdims=True) * inv_n
    o_ref[...] = jnp.maximum(
        d2 * (g2_ref[...] * lax.rsqrt(var2 + BN_EPS)) + be2_ref[...], 0.0)


# ---------------------------------------------------------------------------
# Tiled pass 1: u = h @ W1 (not stored); accumulate [sum(u); sum(u*u)].
# ---------------------------------------------------------------------------
def _stats1_kernel(h_ref, w1_ref, acc_ref):
    @pl.when(pl.program_id(0) == 0)
    def _():
        acc_ref[...] = jnp.zeros_like(acc_ref)

    u = jnp.dot(h_ref[...], w1_ref[...], preferred_element_type=jnp.float32)
    # h is zero-padded along N -> padded rows of u are exactly zero: no mask.
    acc_ref[...] += jnp.concatenate(
        [jnp.sum(u, axis=0, keepdims=True),
         jnp.sum(u * u, axis=0, keepdims=True)], axis=0)


# ---------------------------------------------------------------------------
# Tiled pass 2: recompute u, z = relu(BN1(u)), v = z @ W2 (stored bf16),
# accumulate [sum(v); sum(v*v)] on the f32 value.
# ---------------------------------------------------------------------------
def _bn1_linear2_stats_kernel(h_ref, sc1_ref, sh1_ref, w1_ref, w2_ref,
                              v_ref, acc_ref, *, n_valid, tile_n, masked):
    i = pl.program_id(0)

    @pl.when(i == 0)
    def _():
        acc_ref[...] = jnp.zeros_like(acc_ref)

    u = jnp.dot(h_ref[...], w1_ref[...], preferred_element_type=jnp.float32)
    z = jnp.maximum(u * sc1_ref[...] + sh1_ref[...], 0.0)
    if masked:  # static: only emitted when N was padded to a tile multiple
        row = i * tile_n + lax.broadcasted_iota(jnp.int32, (tile_n, 1), 0)
        z = jnp.where(row < n_valid, z, 0.0)  # padded rows -> 0 -> v rows are 0

    v = jnp.dot(z.astype(jnp.bfloat16), w2_ref[...],
                preferred_element_type=jnp.float32)
    v_ref[...] = v.astype(v_ref.dtype)  # bf16 store; stats use the f32 value
    acc_ref[...] += jnp.concatenate(
        [jnp.sum(v, axis=0, keepdims=True),
         jnp.sum(v * v, axis=0, keepdims=True)], axis=0)


# ---------------------------------------------------------------------------
# Tiled pass 3: out = relu(v * scale2 + shift2)
# ---------------------------------------------------------------------------
def _bn2_relu_kernel(v_ref, sc2_ref, sh2_ref, o_ref):
    o_ref[...] = jnp.maximum(
        v_ref[...].astype(jnp.float32) * sc2_ref[...] + sh2_ref[...], 0.0)


def _stats_to_scale_shift(acc, gamma, beta, n):
    mu = acc[0:1] / n
    # clamp guards E[x^2]-mu^2 cancellation (tiled fallback path only)
    var = jnp.maximum(acc[1:2] / n - mu * mu, 0.0)
    scale = gamma * lax.rsqrt(var + BN_EPS)
    shift = beta - mu * scale
    return scale, shift


def apply_node_func(h, params, *, tile_n=1024, force_tiled=False, interpret=False):
    """h: [N, IN] f32 node features -> [N, OUT] f32 (train-mode BN semantics)."""
    n, in_dim = h.shape
    hid = params["w1"].shape[1]
    out_dim = params["w2"].shape[1]
    hid_p = _round_up(hid, LANE)
    out_p = _round_up(out_dim, LANE)

    f32 = jnp.float32
    bf16 = jnp.bfloat16

    # Weights stored bf16 (MXU operands); zero padding keeps padded feature
    # lanes exactly zero. Linear biases (params["b1"], params["b2"]) are
    # intentionally unused: BN's batch-mean subtraction cancels them exactly.
    w1 = jnp.pad(params["w1"], ((0, 0), (0, hid_p - hid))).astype(bf16)
    w2 = jnp.pad(params["w2"], ((0, hid_p - hid), (0, out_p - out_dim))).astype(bf16)
    g1 = jnp.pad(params["g1"], ((0, 0), (0, hid_p - hid)), constant_values=1.0).astype(f32)
    be1 = jnp.pad(params["be1"], ((0, 0), (0, hid_p - hid))).astype(f32)
    g2 = jnp.pad(params["g2"], ((0, 0), (0, out_p - out_dim)), constant_values=1.0).astype(f32)
    be2 = jnp.pad(params["be2"], ((0, 0), (0, out_p - out_dim))).astype(f32)

    vmem_cap = _vmem_capacity_bytes()
    vmem_limit = int(min(0.75 * vmem_cap, 100 * 1024 * 1024))

    # -------- fused single-launch fast path (small / medium N) --------
    n_pad_f = _round_up(n, SUBLANE)
    fused_bytes = (n_pad_f * (in_dim * 2 + hid_p * 4 * 2 + out_p * 4 * 3)
                   + (in_dim * hid_p + hid_p * out_p) * 2
                   + 8 * (hid_p + out_p) * 4)
    if not force_tiled and fused_bytes <= 0.35 * vmem_cap:
        h_p = jnp.pad(h, ((0, n_pad_f - n), (0, 0))).astype(bf16)
        full = lambda r, c: pl.BlockSpec((r, c), lambda _: (0, 0))
        o = pl.pallas_call(
            functools.partial(_fused_kernel, n_valid=n, masked=(n_pad_f != n)),
            grid=(1,),
            in_specs=[full(n_pad_f, in_dim),
                      full(in_dim, hid_p), full(hid_p, out_p),
                      full(1, hid_p), full(1, hid_p),
                      full(1, out_p), full(1, out_p)],
            out_specs=full(n_pad_f, out_p),
            out_shape=jax.ShapeDtypeStruct((n_pad_f, out_p), f32),
            compiler_params=pltpu.CompilerParams(
                dimension_semantics=("arbitrary",),
                vmem_limit_bytes=vmem_limit),
            interpret=interpret,
        )(h_p, w1, w2, g1, be1, g2, be2)
        return o[:n, :out_dim]

    # -------- tiled 3-pass path (large N, DMA-pipelined) --------
    tn = min(tile_n, _round_up(n, SUBLANE))
    n_pad = _round_up(n, tn)
    n_tiles = n_pad // tn
    masked = n_pad != n

    h_p = jnp.pad(h, ((0, n_pad - n), (0, 0))).astype(bf16)

    cparams_seq = pltpu.CompilerParams(
        dimension_semantics=("arbitrary",),  # resident stat accumulator couples tiles
        vmem_limit_bytes=vmem_limit)
    cparams_par = pltpu.CompilerParams(
        dimension_semantics=("parallel",),
        vmem_limit_bytes=vmem_limit)

    row = lambda width: pl.BlockSpec((tn, width), lambda i: (i, 0))
    const = lambda r, c: pl.BlockSpec((r, c), lambda i: (0, 0))  # resident block

    # pass 1: BN1 stats only (u never written to HBM)
    acc1 = pl.pallas_call(
        _stats1_kernel,
        grid=(n_tiles,),
        in_specs=[row(in_dim), const(in_dim, hid_p)],
        out_specs=const(2, hid_p),
        out_shape=jax.ShapeDtypeStruct((2, hid_p), f32),
        compiler_params=cparams_seq,
        interpret=interpret,
    )(h_p, w1)
    sc1, sh1 = _stats_to_scale_shift(acc1, g1, be1, n)

    # pass 2: recompute u, BN1 + ReLU, v = z @ W2 (bf16 store), BN2 stats
    v, acc2 = pl.pallas_call(
        functools.partial(_bn1_linear2_stats_kernel,
                          n_valid=n, tile_n=tn, masked=masked),
        grid=(n_tiles,),
        in_specs=[row(in_dim), const(1, hid_p), const(1, hid_p),
                  const(in_dim, hid_p), const(hid_p, out_p)],
        out_specs=(row(out_p), const(2, out_p)),
        out_shape=(jax.ShapeDtypeStruct((n_pad, out_p), bf16),
                   jax.ShapeDtypeStruct((2, out_p), f32)),
        compiler_params=cparams_seq,
        interpret=interpret,
    )(h_p, sc1, sh1, w1, w2)
    sc2, sh2 = _stats_to_scale_shift(acc2, g2, be2, n)

    # pass 3: out = relu(BN2(v))
    o = pl.pallas_call(
        _bn2_relu_kernel,
        grid=(n_tiles,),
        in_specs=[row(out_p), const(1, out_p), const(1, out_p)],
        out_specs=row(out_p),
        out_shape=jax.ShapeDtypeStruct((n_pad, out_p), f32),
        compiler_params=cparams_par,
        interpret=interpret,
    )(v, sc2, sh2)

    return o[:n, :out_dim]


def init_params(key, in_dim, hid_dim, out_dim):
    k1, k2, k3, k4 = jax.random.split(key, 4)
    lim1 = 1.0 / jnp.sqrt(in_dim)
    lim2 = 1.0 / jnp.sqrt(hid_dim)
    return {
        "w1": jax.random.uniform(k1, (in_dim, hid_dim), jnp.float32, -lim1, lim1),
        "b1": jax.random.uniform(k2, (1, hid_dim), jnp.float32, -lim1, lim1),
        "g1": jnp.ones((1, hid_dim), jnp.float32),
        "be1": jnp.zeros((1, hid_dim), jnp.float32),
        "w2": jax.random.uniform(k3, (hid_dim, out_dim), jnp.float32, -lim2, lim2),
        "b2": jax.random.uniform(k4, (1, out_dim), jnp.float32, -lim2, lim2),
        "g2": jnp.ones((1, out_dim), jnp.float32),
        "be2": jnp.zeros((1, out_dim), jnp.float32),
    }


def reference(h, p):
    """Pure-JAX reference with the same mixed-precision policy as the kernel
    (bf16 matmul operands, f32 accumulation / BN). Linear biases are kept —
    they are algebraically cancelled by train-mode BN."""
    def bn(x, g, b):
        mu = jnp.mean(x, axis=0, keepdims=True)
        var = jnp.mean((x - mu) ** 2, axis=0, keepdims=True)
        return (x - mu) * lax.rsqrt(var + BN_EPS) * g + b

    def mm(a, w):
        return jnp.dot(a.astype(jnp.bfloat16), w.astype(jnp.bfloat16),
                       preferred_element_type=jnp.float32)

    z = mm(h, p["w1"]) + p["b1"]
    z = jnp.maximum(bn(z, p["g1"], p["be1"]), 0.0)
    y = mm(z, p["w2"]) + p["b2"]
    return jnp.maximum(bn(y, p["g2"], p["be2"]), 0.0)


if __name__ == "__main__":
    N, IN, HID, OUT = 64, 16, 32, 32
    key = jax.random.PRNGKey(0)
    kh, kp = jax.random.split(key)
    h = jax.random.normal(kh, (N, IN), jnp.float32)
    params = init_params(kp, IN, HID, OUT)
    ref = reference(h, params)

    # Fused VMEM-resident fast path (taken for this problem size).
    out = jax.block_until_ready(apply_node_func(h, params))
    assert out.shape == (N, OUT)
    assert bool(jnp.all(jnp.isfinite(out)))
    assert jnp.allclose(out, ref, atol=5e-3, rtol=5e-3), \
        f"fused max abs err {float(jnp.max(jnp.abs(out - ref)))}"

    # Tiled 3-pass fallback (forced; looser tolerance: bf16 v storage +
    # E[x^2]-mu^2 variance on this path).
    out_t = jax.block_until_ready(apply_node_func(h, params, force_tiled=True))
    assert out_t.shape == (N, OUT)
    assert bool(jnp.all(jnp.isfinite(out_t)))
    assert jnp.allclose(out_t, ref, atol=2e-2, rtol=2e-2), \
        f"tiled max abs err {float(jnp.max(jnp.abs(out_t - ref)))}"

    print("KERNEL_OK")
</pallas_src>

<mosaic_0001>
module attributes {stable_mosaic.version = 11 : i64} {
  func.func @_fused_kernel(%arg0: i32, %arg1: memref<64x16xbf16, #tpu.memory_space<vmem>>, %arg2: memref<16x128xbf16, #tpu.memory_space<vmem>>, %arg3: memref<128x128xbf16, #tpu.memory_space<vmem>>, %arg4: memref<1x128xf32, #tpu.memory_space<vmem>>, %arg5: memref<1x128xf32, #tpu.memory_space<vmem>>, %arg6: memref<1x128xf32, #tpu.memory_space<vmem>>, %arg7: memref<1x128xf32, #tpu.memory_space<vmem>>, %arg8: memref<64x128xf32, #tpu.memory_space<vmem>>) attributes {dimension_semantics = [#tpu.dimension_semantics<arbitrary>], iteration_bounds = array<i64: 1>, scalar_prefetch = 0 : i64, scratch_operands = 0 : i64, tpu.core_type = #tpu.core_type<tc>, window_params = [{pipeline_mode = #tpu.pipeline_mode<synchronous>, transform_indices = @transform_0, window_bounds = array<i64: 64, 16>}, {pipeline_mode = #tpu.pipeline_mode<synchronous>, transform_indices = @transform_1, window_bounds = array<i64: 16, 128>}, {pipeline_mode = #tpu.pipeline_mode<synchronous>, transform_indices = @transform_2, window_bounds = array<i64: 128, 128>}, {pipeline_mode = #tpu.pipeline_mode<synchronous>, transform_indices = @transform_3, window_bounds = array<i64: 1, 128>}, {pipeline_mode = #tpu.pipeline_mode<synchronous>, transform_indices = @transform_4, window_bounds = array<i64: 1, 128>}, {pipeline_mode = #tpu.pipeline_mode<synchronous>, transform_indices = @transform_5, window_bounds = array<i64: 1, 128>}, {pipeline_mode = #tpu.pipeline_mode<synchronous>, transform_indices = @transform_6, window_bounds = array<i64: 1, 128>}, {pipeline_mode = #tpu.pipeline_mode<synchronous>, transform_indices = @transform_7, window_bounds = array<i64: 64, 128>}]} {
    %c0 = arith.constant 0 : index
    %c0_0 = arith.constant 0 : index
    %0 = vector.load %arg1[%c0, %c0_0] : memref<64x16xbf16, #tpu.memory_space<vmem>>, vector<64x16xbf16>
    %c0_1 = arith.constant 0 : index
    %c0_2 = arith.constant 0 : index
    %1 = vector.load %arg2[%c0_1, %c0_2] : memref<16x128xbf16, #tpu.memory_space<vmem>>, vector<16x128xbf16>
    %cst = arith.constant dense<0.000000e+00> : vector<64x128xf32>
    %2 = tpu.matmul %0, %1, %cst {dimension_numbers = #tpu.dot_dimension_numbers<[1], [0], [0], [1], [0, 0, 1, 1], [], []>} : vector<64x16xbf16>, vector<16x128xbf16>, vector<64x128xf32> -> vector<64x128xf32>
    %cst_3 = arith.constant dense<0.000000e+00> : vector<128xf32>
    %3 = vector.multi_reduction <add>, %2, %cst_3 [0] : vector<64x128xf32> to vector<128xf32>
    %4 = vector.shape_cast %3 : vector<128xf32> to vector<1x128xf32>
    %cst_4 = arith.constant 1.562500e-02 : f32
    %5 = vector.broadcast %cst_4 : f32 to vector<1x128xf32>
    %6 = arith.mulf %4, %5 : vector<1x128xf32>
    %7 = vector.broadcast %6 : vector<1x128xf32> to vector<64x128xf32>
    %8 = arith.subf %2, %7 : vector<64x128xf32>
    %9 = arith.mulf %8, %8 : vector<64x128xf32>
    %cst_5 = arith.constant dense<0.000000e+00> : vector<128xf32>
    %10 = vector.multi_reduction <add>, %9, %cst_5 [0] : vector<64x128xf32> to vector<128xf32>
    %11 = vector.shape_cast %10 : vector<128xf32> to vector<1x128xf32>
    %cst_6 = arith.constant 1.562500e-02 : f32
    %12 = vector.broadcast %cst_6 : f32 to vector<1x128xf32>
    %13 = arith.mulf %11, %12 : vector<1x128xf32>
    %c0_7 = arith.constant 0 : index
    %c0_8 = arith.constant 0 : index
    %14 = vector.load %arg4[%c0_7, %c0_8] : memref<1x128xf32, #tpu.memory_space<vmem>>, vector<1x128xf32>
    %cst_9 = arith.constant 9.99999974E-6 : f32
    %15 = vector.broadcast %cst_9 : f32 to vector<1x128xf32>
    %16 = arith.addf %13, %15 : vector<1x128xf32>
    %17 = math.rsqrt %16 : vector<1x128xf32>
    %18 = arith.mulf %14, %17 : vector<1x128xf32>
    %19 = vector.broadcast %18 : vector<1x128xf32> to vector<64x128xf32>
    %20 = arith.mulf %8, %19 : vector<64x128xf32>
    %c0_10 = arith.constant 0 : index
    %c0_11 = arith.constant 0 : index
    %21 = vector.load %arg5[%c0_10, %c0_11] : memref<1x128xf32, #tpu.memory_space<vmem>>, vector<1x128xf32>
    %22 = vector.broadcast %21 : vector<1x128xf32> to vector<64x128xf32>
    %23 = arith.addf %20, %22 : vector<64x128xf32>
    %cst_12 = arith.constant 0.000000e+00 : f32
    %24 = vector.broadcast %cst_12 : f32 to vector<64x128xf32>
    %25 = arith.maximumf %23, %24 : vector<64x128xf32>
    %26 = arith.truncf %25 : vector<64x128xf32> to vector<64x128xbf16>
    %c0_13 = arith.constant 0 : index
    %c0_14 = arith.constant 0 : index
    %27 = vector.load %arg3[%c0_13, %c0_14] : memref<128x128xbf16, #tpu.memory_space<vmem>>, vector<128x128xbf16>
    %cst_15 = arith.constant dense<0.000000e+00> : vector<64x128xf32>
    %28 = tpu.matmul %26, %27, %cst_15 {dimension_numbers = #tpu.dot_dimension_numbers<[1], [0], [0], [1], [0, 0, 1, 1], [], []>} : vector<64x128xbf16>, vector<128x128xbf16>, vector<64x128xf32> -> vector<64x128xf32>
    %cst_16 = arith.constant dense<0.000000e+00> : vector<128xf32>
    %29 = vector.multi_reduction <add>, %28, %cst_16 [0] : vector<64x128xf32> to vector<128xf32>
    %30 = vector.shape_cast %29 : vector<128xf32> to vector<1x128xf32>
    %cst_17 = arith.constant 1.562500e-02 : f32
    %31 = vector.broadcast %cst_17 : f32 to vector<1x128xf32>
    %32 = arith.mulf %30, %31 : vector<1x128xf32>
    %33 = vector.broadcast %32 : vector<1x128xf32> to vector<64x128xf32>
    %34 = arith.subf %28, %33 : vector<64x128xf32>
    %35 = arith.mulf %34, %34 : vector<64x128xf32>
    %cst_18 = arith.constant dense<0.000000e+00> : vector<128xf32>
    %36 = vector.multi_reduction <add>, %35, %cst_18 [0] : vector<64x128xf32> to vector<128xf32>
    %37 = vector.shape_cast %36 : vector<128xf32> to vector<1x128xf32>
    %cst_19 = arith.constant 1.562500e-02 : f32
    %38 = vector.broadcast %cst_19 : f32 to vector<1x128xf32>
    %39 = arith.mulf %37, %38 : vector<1x128xf32>
    %c0_20 = arith.constant 0 : index
    %c0_21 = arith.constant 0 : index
    %40 = vector.load %arg6[%c0_20, %c0_21] : memref<1x128xf32, #tpu.memory_space<vmem>>, vector<1x128xf32>
    %cst_22 = arith.constant 9.99999974E-6 : f32
    %41 = vector.broadcast %cst_22 : f32 to vector<1x128xf32>
    %42 = arith.addf %39, %41 : vector<1x128xf32>
    %43 = math.rsqrt %42 : vector<1x128xf32>
    %44 = arith.mulf %40, %43 : vector<1x128xf32>
    %45 = vector.broadcast %44 : vector<1x128xf32> to vector<64x128xf32>
    %46 = arith.mulf %34, %45 : vector<64x128xf32>
    %c0_23 = arith.constant 0 : index
    %c0_24 = arith.constant 0 : index
    %47 = vector.load %arg7[%c0_23, %c0_24] : memref<1x128xf32, #tpu.memory_space<vmem>>, vector<1x128xf32>
    %48 = vector.broadcast %47 : vector<1x128xf32> to vector<64x128xf32>
    %49 = arith.addf %46, %48 : vector<64x128xf32>
    %cst_25 = arith.constant 0.000000e+00 : f32
    %50 = vector.broadcast %cst_25 : f32 to vector<64x128xf32>
    %51 = arith.maximumf %49, %50 : vector<64x128xf32>
    %c0_26 = arith.constant 0 : index
    %c0_27 = arith.constant 0 : index
    %52 = vector.load %arg8[%c0_26, %c0_27] : memref<64x128xf32, #tpu.memory_space<vmem>>, vector<64x128xf32>
    tpu.vector_store %arg8[%c0_26, %c0_27], %51 {strides = array<i32>} : memref<64x128xf32, #tpu.memory_space<vmem>>, vector<64x128xf32>,
    return
  }
  func.func @transform_0(%arg0: i32) -> (i32, i32) {
    %c0_i32 = arith.constant 0 : i32
    %c0_i32_0 = arith.constant 0 : i32
    %c0_i32_1 = arith.constant 0 : i32
    return %c0_i32, %c0_i32_0 : i32, i32
  }
  func.func @transform_1(%arg0: i32) -> (i32, i32) {
    %c0_i32 = arith.constant 0 : i32
    %c0_i32_0 = arith.constant 0 : i32
    %c0_i32_1 = arith.constant 0 : i32
    return %c0_i32, %c0_i32_0 : i32, i32
  }
  func.func @transform_2(%arg0: i32) -> (i32, i32) {
    %c0_i32 = arith.constant 0 : i32
    %c0_i32_0 = arith.constant 0 : i32
    %c0_i32_1 = arith.constant 0 : i32
    return %c0_i32, %c0_i32_0 : i32, i32
  }
  func.func @transform_3(%arg0: i32) -> (i32, i32) {
    %c0_i32 = arith.constant 0 : i32
    %c0_i32_0 = arith.constant 0 : i32
    %c0_i32_1 = arith.constant 0 : i32
    return %c0_i32, %c0_i32_0 : i32, i32
  }
  func.func @transform_4(%arg0: i32) -> (i32, i32) {
    %c0_i32 = arith.constant 0 : i32
    %c0_i32_0 = arith.constant 0 : i32
    %c0_i32_1 = arith.constant 0 : i32
    return %c0_i32, %c0_i32_0 : i32, i32
  }
  func.func @transform_5(%arg0: i32) -> (i32, i32) {
    %c0_i32 = arith.constant 0 : i32
    %c0_i32_0 = arith.constant 0 : i32
    %c0_i32_1 = arith.constant 0 : i32
    return %c0_i32, %c0_i32_0 : i32, i32
  }
  func.func @transform_6(%arg0: i32) -> (i32, i32) {
    %c0_i32 = arith.constant 0 : i32
    %c0_i32_0 = arith.constant 0 : i32
    %c0_i32_1 = arith.constant 0 : i32
    return %c0_i32, %c0_i32_0 : i32, i32
  }
  func.func @transform_7(%arg0: i32) -> (i32, i32) {
    %c0_i32 = arith.constant 0 : i32
    %c0_i32_0 = arith.constant 0 : i32
    %c0_i32_1 = arith.constant 0 : i32
    return %c0_i32, %c0_i32_0 : i32, i32
  }
}

</mosaic_0001>

<bundles_post_ra>
// kernel: tpu_custom_call.1
= control target key start
LH: loop header
LB: loop body
LE: loop exit
PB: predicated region body
PF: predicated region fallthrough
CT: control target
= control target key end

     0   :  { %12 = vsyncpa [#allocation3], 0  ;;  %s752_s0 = inlined_call_operand.vmem [shape: bf16[64,16], index: 0, kind: input, shape index: {}]   ;;  %s753_s1 = inlined_call_operand.vmem [shape: bf16[16,128], index: 1, kind: input, shape index: {}]   ;;  %s754_s2 = inlined_call_operand.hbm [shape: bf16[128,128], index: 2, kind: input, shape index: {}]   ;;  %s755_s3 = inlined_call_operand.vmem [shape: f32[1,128], index: 3, kind: input, shape index: {}]   ;;  %s756_s4 = inlined_call_operand.vmem [shape: f32[1,128], index: 4, kind: input, shape index: {}]   ;;  %s757_s5 = inlined_call_operand.vmem [shape: f32[1,128], index: 5, kind: input, shape index: {}]   ;;  %s758_s6 = inlined_call_operand.vmem [shape: f32[1,128], index: 6, kind: input, shape index: {}]   ;;  %s759_s7 = inlined_call_operand.hbm [shape: f32[64,128], index: 7, kind: output, shape index: {}]  }
   0x1   :  { %13 = vsyncpa [#allocation4], 0  ;;  %s641_s24 = smov [#allocation2]   ;;  %s593_s28 = scalar_lea.hbm %s754_s2, 1024 }
   0x2   :  { %s23_s25 = sshll.u32 %s641_s24, 4  ;;  %p594_p0 = scmp.ne.s32.totalorder %s754_s2, %s593_s28  ;;  %s24_s25 = int_to_ptr.vmem [resolvable:$true] %s23_s25 }
   0x3   :  { %p597_p1 = scmp.lt.u32.totalorder %s593_s28, %s754_s2 }
   0x5   :  { %p599_p2 = pnand %p597_p1, %p594_p0 }
   0x7   :  { %602 = shalt.err (!%p599_p2)
}
   0x8   :  { %s603_s10 = scalar_lea.vmem %s24_s25, 1024  ;;  %p608_p4 = scmp.lt.s32.totalorder %s24_s25, %s24_s25 }
   0x9   :  { %p604_p3 = scmp.ne.s32.totalorder %s24_s25, %s603_s10  ;;  %p609_p5 = scmp.lt.s32.totalorder %s603_s10, %s603_s10 }
   0xb   :  { %p610_p6 = por %p609_p5, %p608_p4 }
   0xd   :  { %p611_p7 = pnand %p610_p6, %p604_p3 }
   0xf   :  { %614 = shalt.err (!%p611_p7)
}
  0x10   :  { %s642_s11 = smov 64   ;;  %s643_s12 = smov 4  }
  0x11   :  { %29 = dma.hbm_to_vmem [thread:$0]  %s754_s2, 1024, %s24_s25, [#allocation3], %s642_s11, %s642_s11, %s643_s12  }
  0x12   :  { %637 = dma.done.wait [#allocation3], 1024  }
  0x13   :  { %638 = vsyncadd [#allocation3], 4294966272  ;;  %v576_v0 = vld [vmem:[%s753_s1] sm:$0xff]   ;;  %vm78_vm0 = vcmask 130048   ;;  %v578_v2 = vld [vmem:[%s752_s0 + $0x8] sm:$0xff]   ;;  %s644_s28 = smov [#allocation5]  }
  0x14   :  { %v577_v1 = vld [vmem:[%s752_s0] sm:$0xff]   ;;  %520 = vmatprep.subr.bf16.mxu0 %v576_v0  ;;  %v579_v3 = vld [vmem:[%s752_s0 + $0x10] sm:$0xff]   ;;  %v580_v4 = vld [vmem:[%s752_s0 + $0x18] sm:$0xff]   ;;  %s472_s29 = sshll.u32 %s644_s28, 4  ;;  %s733_s29 = int_to_ptr.vmem [resolvable:$true] %s472_s29 }
  0x15   :  { %521 = vmatpush3.bf16.msra.mxu0 %v576_v0  ;;  %522 = vmatprep.mubr.msk.bf16.mxu0 %vm78_vm0, %v577_v1  ;;  %v581_v5 = vld [vmem:[#allocation2] sm:$0xff]   ;;  %v582_v6 = vld [vmem:[#allocation2 + $0x8] sm:$0xff]   ;;  %v583_v7 = vld [vmem:[#allocation2 + $0x10] sm:$0xff]   ;;  %p620_p9 = scmp.lt.s32.totalorder %s733_s29, %s733_s29 }
  0x16   :  { %530 = vmatprep.subr.bf16.mxu0 %v581_v5  ;;  %554 = vmatprep.subr.bf16.mxu1 %v581_v5  ;;  %v584_v8 = vld [vmem:[#allocation2 + $0x18] sm:$0xff]   ;;  %v585_v9 = vld [vmem:[#allocation2 + $0x20] sm:$0xff]   ;;  %v586_v10 = vld [vmem:[#allocation2 + $0x28] sm:$0xff]  }
  0x17   :  { %562 = vmatpush3.bf16.msra.mxu1 %v581_v5  ;;  %v587_v11 = vld [vmem:[#allocation2 + $0x30] sm:$0xff]   ;;  %v588_v12 = vld [vmem:[#allocation2 + $0x38] sm:$0xff]  }
  0x18   :  { %523 = vmatmul.mubr.msk.bf16.vlgmr.msra.gmra.mrb[0].mxu0 %vm78_vm0, %v578_v2  ;;  %555 = vmatprep.subr.bf16.mxu1 %v582_v6  ;;  %v205_v2 = vlaneseq }
  0x19   :  { %526 = vmatprep.mubr.msk.bf16.mxu0 %vm78_vm0, %v579_v3  ;;  %531 = vmatpush3.bf16.msra.mxu0 %v581_v5 }
  0x1a   :  { %532 = vmatprep.subr.bf16.mxu0 %v582_v6  ;;  %v714_v3 = vshrl.u32 %v205_v2, 7 }
  0x1b   :  { %563 = vmatpush3.bf16.msra.mxu1 %v582_v6 }
  0x1c   :  { %556 = vmatprep.subr.bf16.mxu1 %v583_v7  ;;  %v207_v5 = vsub.s32 0, %v714_v3 }
  0x1d   :  { %533 = vmatpush3.bf16.msra.mxu0 %v582_v6 }
  0x1e   :  { %534 = vmatprep.subr.bf16.mxu0 %v583_v7 }
  0x1f   :  { %564 = vmatpush3.bf16.msra.mxu1 %v583_v7 }
  0x20   :  { %527 = vmatmul.mubr.msk.bf16.gmra.mrb[4].mxu0 %vm78_vm0, %v580_v4  ;;  %557 = vmatprep.subr.bf16.mxu1 %v584_v8  ;;  %v200_v4 = vld [vmem:[%s755_s3] sm:$0x1] }
  0x21   :  { %535 = vmatpush3.bf16.msra.mxu0 %v583_v7 }
  0x22   :  { %536 = vmatprep.subr.bf16.mxu0 %v584_v8 }
  0x23   :  { %565 = vmatpush3.bf16.msra.mxu1 %v584_v8 }
  0x24   :  { %558 = vmatprep.subr.bf16.mxu1 %v585_v9 }
  0x25   :  { %537 = vmatpush3.bf16.msra.mxu0 %v584_v8 }
  0x26   :  { %538 = vmatprep.subr.bf16.mxu0 %v585_v9 }
  0x27   :  { %566 = vmatpush3.bf16.msra.mxu1 %v585_v9 }
  0x28   :  { %559 = vmatprep.subr.bf16.mxu1 %v586_v10 }
  0x29   :  { %539 = vmatpush3.bf16.msra.mxu0 %v585_v9  ;;  %v493_v9 = vld [vmem:[%s756_s4] ss:$0 sm:$0xff] }
  0x2a   :  { %540 = vmatprep.subr.bf16.mxu0 %v586_v10 }
  0x2b   :  { %567 = vmatpush3.bf16.msra.mxu1 %v586_v10 }
  0x2c   :  { %560 = vmatprep.subr.bf16.mxu1 %v587_v11 }
  0x2d   :  { %541 = vmatpush3.bf16.msra.mxu0 %v586_v10 }
  0x2e   :  { %542 = vmatprep.subr.bf16.mxu0 %v587_v11 }
  0x2f   :  { %568 = vmatpush3.bf16.msra.mxu1 %v587_v11 }
  0x30   :  { %561 = vmatprep.subr.bf16.mxu1 %v588_v12 }
  0x31   :  { %543 = vmatpush3.bf16.msra.mxu0 %v587_v11 }
  0x32   :  { %544 = vmatprep.subr.bf16.mxu0 %v588_v12 }
  0x33   :  { %569 = vmatpush3.bf16.msra.mxu1 %v588_v12 }
  0x35   :  { %545 = vmatpush3.bf16.msra.mxu0 %v588_v12 }
  0xeb   :  { %v524_v13 = vpop.f32.mrb[0].mxu0 }
  0xec   :  { %v125_v14 = vpop.f32.mrb[1].mxu0 }
  0xed   :  { %v525_v15 = vpop.f32.mrb[2].mxu0 }
  0xee   :  { %v128_v16 = vpop.f32.mrb[3].mxu0 }
  0xef   :  { %v156_v17 = vadd.f32 %v128_v16, %v125_v14 }
  0xf1   :  { %v157_v18 = vadd.f32 %v524_v13, %v156_v17 }
  0xf3   :  { %v528_v19 = vpop.f32.mrb[4].mxu0  ;;  %v158_v20 = vadd.f32 %v525_v15, %v157_v18 }
  0xf4   :  { %v141_v21 = vpop.f32.mrb[5].mxu0 }
  0xf5   :  { %v159_v22 = vadd.f32 %v158_v20, %v141_v21  ;;  %v529_v23 = vpop.f32.mrb[6].mxu0 }
  0xf6   :  { %v144_v24 = vpop.f32.mrb[7].mxu0 }
  0xf7   :  { %v160_v25 = vadd.f32 %v159_v22, %v144_v24 }
  0xf9   :  { %v161_v26 = vadd.f32 %v528_v19, %v160_v25 }
  0xfb   :  { %v162_v27 = vadd.f32 %v529_v23, %v161_v26 }
  0xfd   :  { %v163_v28 = vrot.slane %v162_v27, 4 }
  0xff   :  { %v164_v29 = vadd.f32 %v163_v28, %v162_v27 }
 0x101   :  { %v165_v30 = vrot.slane %v164_v29, 2 }
 0x103   :  { %v166_v31 = vadd.f32 %v165_v30, %v164_v29 }
 0x105   :  { %v167_v32 = vrot.slane %v166_v31, 1 }
 0x107   :  { %v168_v33 = vadd.f32 %v167_v32, %v166_v31 }
 0x109   :  { %v169_v34 = vmul.f32 0.015625, %v168_v33 }
 0x10b   :  { %v170_v35 = vsub.f32 %v125_v14, %v169_v34  ;;  %v171_v36 = vsub.f32 %v128_v16, %v169_v34  ;;  %v172_v37 = vsub.f32 %v524_v13, %v169_v34  ;;  %v173_v38 = vsub.f32 %v525_v15, %v169_v34 }
 0x10c   :  { %v174_v39 = vsub.f32 %v141_v21, %v169_v34  ;;  %v175_v40 = vsub.f32 %v144_v24, %v169_v34  ;;  %v176_v41 = vsub.f32 %v528_v19, %v169_v34  ;;  %v177_v42 = vsub.f32 %v529_v23, %v169_v34 }
 0x10d   :  { %v178_v43 = vmul.f32 %v170_v35, %v170_v35  ;;  %v179_v44 = vmul.f32 %v171_v36, %v171_v36  ;;  %v180_v45 = vmul.f32 %v172_v37, %v172_v37  ;;  %v181_v47 = vmul.f32 %v173_v38, %v173_v38 }
 0x10e   :  { %v182_v49 = vmul.f32 %v174_v39, %v174_v39  ;;  %v183_v51 = vmul.f32 %v175_v40, %v175_v40  ;;  %v184_v53 = vmul.f32 %v176_v41, %v176_v41  ;;  %v185_v55 = vmul.f32 %v177_v42, %v177_v42 }
 0x10f   :  { %v186_v46 = vadd.f32 %v179_v44, %v178_v43 }
 0x111   :  { %v187_v48 = vadd.f32 %v186_v46, %v180_v45 }
 0x113   :  { %v188_v50 = vadd.f32 %v187_v48, %v181_v47 }
 0x115   :  { %v189_v52 = vadd.f32 %v188_v50, %v182_v49 }
 0x117   :  { %v190_v54 = vadd.f32 %v189_v52, %v183_v51 }
 0x119   :  { %v191_v56 = vadd.f32 %v190_v54, %v184_v53 }
 0x11b   :  { %v192_v57 = vadd.f32 %v191_v56, %v185_v55 }
 0x11d   :  { %v193_v58 = vrot.slane %v192_v57, 4 }
 0x11f   :  { %v194_v59 = vadd.f32 %v193_v58, %v192_v57 }
 0x121   :  { %v195_v60 = vrot.slane %v194_v59, 2 }
 0x123   :  { %v196_v61 = vadd.f32 %v195_v60, %v194_v59 }
 0x125   :  { %v197_v62 = vrot.slane %v196_v61, 1 }
 0x127   :  { %v198_v63 = vadd.f32 %v197_v62, %v196_v61 }
 0x129   :  { %v199_v0 = vmul.f32 0.015625, %v198_v63 }
 0x12b   :  { %v201_v1 = vadd.f32 1e-05, %v199_v0 }
 0x12d   :  { %589 = vrsqrt.f32 %v201_v1 }
 0x137   :  { %v590_v6 = vpop.eup %589 }
 0x138   :  { %v203_v7 = vmul.f32 %v590_v6, %v200_v4 }
 0x13a   :  { %v208_v8 = vrot.slane %v203_v7, %v207_v5 }
 0x13c   :  { %v213_v10 = vmul.f32 %v208_v8, %v173_v38  ;;  %v215_v11 = vmul.f32 %v208_v8, %v175_v40  ;;  %v210_v12 = vmul.f32 %v208_v8, %v170_v35  ;;  %v211_v13 = vmul.f32 %v208_v8, %v171_v36 }
 0x13d   :  { %v214_v14 = vmul.f32 %v208_v8, %v174_v39  ;;  %v212_v15 = vmul.f32 %v208_v8, %v172_v37  ;;  %v216_v16 = vmul.f32 %v208_v8, %v176_v41  ;;  %v217_v17 = vmul.f32 %v208_v8, %v177_v42 }
 0x13e   :  { %v225_v18 = vadd.f32 %v493_v9, %v210_v12  ;;  %v226_v19 = vadd.f32 %v493_v9, %v211_v13  ;;  %v230_v20 = vadd.f32 %v493_v9, %v215_v11  ;;  %v228_v21 = vadd.f32 %v493_v9, %v213_v10 }
 0x13f   :  { %v229_v22 = vadd.f32 %v493_v9, %v214_v14  ;;  %v227_v23 = vadd.f32 %v493_v9, %v212_v15  ;;  %v231_v24 = vadd.f32 %v493_v9, %v216_v16  ;;  %v232_v25 = vadd.f32 %v493_v9, %v217_v17 }
 0x140   :  { %v233_v26 = vmax.f32 %v225_v18, 0.0  ;;  %v234_v27 = vmax.f32 %v226_v19, 0.0  ;;  %v238_v28 = vmax.f32 %v230_v20, 0.0  ;;  %v236_v29 = vmax.f32 %v228_v21, 0.0 }
 0x141   :  { %v237_v30 = vmax.f32 %v229_v22, 0.0  ;;  %v235_v31 = vmax.f32 %v227_v23, 0.0  ;;  %v239_v32 = vmax.f32 %v231_v24, 0.0  ;;  %v240_v33 = vmax.f32 %v232_v25, 0.0 }
 0x142   :  { %v241_v34 = vpack.c.bf16 %v234_v27, %v233_v26 }
 0x143   :  { %v243_v35 = vpack.c.bf16 %v238_v28, %v237_v30  ;;  %v242_v36 = vpack.c.bf16 %v236_v29, %v235_v31  ;;  %v244_v37 = vpack.c.bf16 %v240_v33, %v239_v32  ;;  %v418_v29 = vld [vmem:[%s757_s5] sm:$0x1]  ;;  %s615_s5 = scalar_lea.vmem %s733_s29, 1024 }
 0x144   :  { %546 = vmatprep.mubr.bf16.mxu0 %v241_v34  ;;  %v502_v33 = vld [vmem:[%s758_s6] ss:$0 sm:$0xff]  ;;  %p616_p8 = scmp.ne.s32.totalorder %s733_s29, %s615_s5  ;;  %p621_p10 = scmp.lt.s32.totalorder %s615_s5, %s615_s5 }
 0x145   :  { %550 = vmatprep.mubr.bf16.mxu1 %v243_v35  ;;  %547 = vmatmul.mubr.bf16.vlgmr.msra.gmra.mrb[8].mxu0 %v242_v36 }
 0x146   :  { %551 = vmatmul.mubr.bf16.vlgmr.msra.gmra.mrb[0].mxu1 %v244_v37  ;;  %p622_p11 = por %p621_p10, %p620_p9 }
 0x148   :  { %p623_p12 = pnand %p622_p11, %p616_p8 }
 0x218   :  { %v548_v38 = vpop.f32.mrb[8].mxu0 }
 0x219   :  { %v552_v39 = vpop.f32.mrb[0].mxu1  ;;  %v343_v40 = vpop.f32.mrb[9].mxu0 }
 0x21a   :  { %v359_v41 = vpop.f32.mrb[1].mxu1  ;;  %v549_v42 = vpop.f32.mrb[10].mxu0 }
 0x21b   :  { %v553_v43 = vpop.f32.mrb[2].mxu1  ;;  %v346_v44 = vpop.f32.mrb[11].mxu0 }
 0x21c   :  { %v374_v45 = vadd.f32 %v346_v44, %v343_v40  ;;  %v362_v46 = vpop.f32.mrb[3].mxu1 }
 0x21e   :  { %v375_v47 = vadd.f32 %v548_v38, %v374_v45 }
 0x220   :  { %v376_v48 = vadd.f32 %v549_v42, %v375_v47 }
 0x222   :  { %v377_v49 = vadd.f32 %v376_v48, %v359_v41 }
 0x224   :  { %v378_v50 = vadd.f32 %v377_v49, %v362_v46 }
 0x226   :  { %v379_v51 = vadd.f32 %v552_v39, %v378_v50 }
 0x228   :  { %v380_v52 = vadd.f32 %v553_v43, %v379_v51 }
 0x22a   :  { %v381_v53 = vrot.slane %v380_v52, 4 }
 0x22c   :  { %v382_v54 = vadd.f32 %v381_v53, %v380_v52 }
 0x22e   :  { %v383_v55 = vrot.slane %v382_v54, 2 }
 0x230   :  { %v384_v56 = vadd.f32 %v383_v55, %v382_v54 }
 0x232   :  { %v385_v57 = vrot.slane %v384_v56, 1 }
 0x234   :  { %v386_v58 = vadd.f32 %v385_v57, %v384_v56 }
 0x236   :  { %v387_v59 = vmul.f32 0.015625, %v386_v58 }
 0x238   :  { %v388_v60 = vsub.f32 %v343_v40, %v387_v59  ;;  %v389_v61 = vsub.f32 %v346_v44, %v387_v59  ;;  %v390_v62 = vsub.f32 %v548_v38, %v387_v59  ;;  %v391_v63 = vsub.f32 %v549_v42, %v387_v59 }
 0x239   :  { %v392_v0 = vsub.f32 %v359_v41, %v387_v59  ;;  %v393_v1 = vsub.f32 %v362_v46, %v387_v59  ;;  %v394_v2 = vsub.f32 %v552_v39, %v387_v59  ;;  %v395_v4 = vsub.f32 %v553_v43, %v387_v59 }
 0x23a   :  { %v396_v6 = vmul.f32 %v388_v60, %v388_v60  ;;  %v397_v7 = vmul.f32 %v389_v61, %v389_v61  ;;  %v398_v8 = vmul.f32 %v390_v62, %v390_v62  ;;  %v399_v10 = vmul.f32 %v391_v63, %v391_v63 }
 0x23b   :  { %v400_v12 = vmul.f32 %v392_v0, %v392_v0  ;;  %v401_v14 = vmul.f32 %v393_v1, %v393_v1  ;;  %v402_v16 = vmul.f32 %v394_v2, %v394_v2  ;;  %v403_v18 = vmul.f32 %v395_v4, %v395_v4 }
 0x23c   :  { %v404_v9 = vadd.f32 %v397_v7, %v396_v6 }
 0x23e   :  { %v405_v11 = vadd.f32 %v404_v9, %v398_v8 }
 0x240   :  { %v406_v13 = vadd.f32 %v405_v11, %v399_v10 }
 0x242   :  { %v407_v15 = vadd.f32 %v406_v13, %v400_v12 }
 0x244   :  { %v408_v17 = vadd.f32 %v407_v15, %v401_v14 }
 0x246   :  { %v409_v19 = vadd.f32 %v408_v17, %v402_v16 }
 0x248   :  { %v410_v20 = vadd.f32 %v409_v19, %v403_v18 }
 0x24a   :  { %v411_v21 = vrot.slane %v410_v20, 4 }
 0x24c   :  { %v412_v22 = vadd.f32 %v411_v21, %v410_v20 }
 0x24e   :  { %v413_v23 = vrot.slane %v412_v22, 2 }
 0x250   :  { %v414_v24 = vadd.f32 %v413_v23, %v412_v22 }
 0x252   :  { %v415_v25 = vrot.slane %v414_v24, 1 }
 0x254   :  { %v416_v26 = vadd.f32 %v415_v25, %v414_v24 }
 0x256   :  { %v417_v27 = vmul.f32 0.015625, %v416_v26 }
 0x258   :  { %v419_v28 = vadd.f32 1e-05, %v417_v27 }
 0x25a   :  { %591 = vrsqrt.f32 %v419_v28 }
 0x264   :  { %v592_v30 = vpop.eup %591 }
 0x265   :  { %v421_v31 = vmul.f32 %v592_v30, %v418_v29 }
 0x267   :  { %v426_v32 = vrot.slane %v421_v31, %v207_v5 }
 0x269   :  { %v428_v34 = vmul.f32 %v426_v32, %v388_v60  ;;  %v429_v35 = vmul.f32 %v426_v32, %v389_v61  ;;  %v430_v36 = vmul.f32 %v426_v32, %v390_v62  ;;  %v431_v37 = vmul.f32 %v426_v32, %v391_v63 }
 0x26a   :  { %v432_v38 = vmul.f32 %v426_v32, %v392_v0  ;;  %v433_v39 = vmul.f32 %v426_v32, %v393_v1  ;;  %v434_v40 = vmul.f32 %v426_v32, %v394_v2  ;;  %v435_v41 = vmul.f32 %v426_v32, %v395_v4 }
 0x26b   :  { %v443_v42 = vadd.f32 %v502_v33, %v428_v34  ;;  %v444_v43 = vadd.f32 %v502_v33, %v429_v35  ;;  %v445_v44 = vadd.f32 %v502_v33, %v430_v36  ;;  %v446_v45 = vadd.f32 %v502_v33, %v431_v37 }
 0x26c   :  { %v447_v3 = vadd.f32 %v502_v33, %v432_v38  ;;  %v448_v5 = vadd.f32 %v502_v33, %v433_v39  ;;  %v449_v46 = vadd.f32 %v502_v33, %v434_v40  ;;  %v450_v47 = vadd.f32 %v502_v33, %v435_v41 }
 0x26d   :  { %v451_v48 = vmax.f32 %v443_v42, 0.0  ;;  %v452_v49 = vmax.f32 %v444_v43, 0.0  ;;  %v453_v50 = vmax.f32 %v445_v44, 0.0  ;;  %v454_v51 = vmax.f32 %v446_v45, 0.0 }
 0x26e   :  { %v455_v52 = vmax.f32 %v447_v3, 0.0  ;;  %v456_v53 = vmax.f32 %v448_v5, 0.0  ;;  %v457_v54 = vmax.f32 %v449_v46, 0.0  ;;  %v458_v55 = vmax.f32 %v450_v47, 0.0 }
 0x26f   :  { %459 = vst [vmem:[#allocation5] sm:$0xff] %v451_v48  ;;  %460 = vst [vmem:[#allocation5 + $0x8] sm:$0xff] %v452_v49 }
 0x270   :  { %461 = vst [vmem:[#allocation5 + $0x10] sm:$0xff] %v453_v50  ;;  %462 = vst [vmem:[#allocation5 + $0x18] sm:$0xff] %v454_v51 }
 0x271   :  { %463 = vst [vmem:[#allocation5 + $0x20] sm:$0xff] %v455_v52  ;;  %464 = vst [vmem:[#allocation5 + $0x28] sm:$0xff] %v456_v53 }
 0x272   :  { %465 = vst [vmem:[#allocation5 + $0x30] sm:$0xff] %v457_v54  ;;  %466 = vst [vmem:[#allocation5 + $0x38] sm:$0xff] %v458_v55 }
 0x273   :  { %626 = shalt.err (!%p623_p12)
}
 0x274   :  { %s627_s8 = scalar_lea.hbm %s759_s7, 1024 }
 0x275   :  { %p628_p13 = scmp.ne.s32.totalorder %s759_s7, %s627_s8  ;;  %p631_p0 = scmp.lt.u32.totalorder %s627_s8, %s759_s7 }
 0x277   :  { %p633_p1 = pnand %p631_p0, %p628_p13 }
 0x279   :  { %636 = shalt.err (!%p633_p1)
}
 0x27a   :  { %s645_s13 = smov 128   ;;  %s646_s14 = smov 8  }
 0x27b   :  { %478 = dma.vmem_to_hbm [thread:$0]  %s733_s29, 1024, %s759_s7, [#allocation4], %s645_s13, %s645_s13, %s646_s14  }
 0x27c   :  { %639 = dma.done.wait [#allocation4], 1024  }
 0x27d   :  { %640 = vsyncadd [#allocation4], 4294966272 }
 0x27e   :  { %482 = vsyncpa [#allocation3], 1 }
 0x27f   :  { %483 = vsyncpa [#allocation4], 1 }

</bundles_post_ra>
